<compile_context>
chip_gen: v5e
topology: v5e:2x2
jax: 0.10.0
libtpu: 0.0.40
codegen_flags: <defaults>
</compile_context>

<pallas_src>
import jax
import jax.numpy as jnp
from jax.experimental import pallas as pl
from jax.experimental.pallas import tpu as pltpu


def _head_kernel(x_ref, w1_ref, b1_ref, w2_ref, b2_ref, o_ref):
    # Hidden layer: (TILE_M, D) @ (D, 64) -> f32 acc, + bias, ReLU (VPU).
    h = jnp.dot(x_ref[...], w1_ref[...], preferred_element_type=jnp.float32)
    h = jnp.maximum(h + b1_ref[...], 0.0)
    # Output layer: (TILE_M, 64) @ (64, C) -> f32 acc, + bias.  C stays at its
    # natural width: the masked store is far cheaper than 128-wide padded writeback.
    logits = jnp.dot(h, w2_ref[...], preferred_element_type=jnp.float32)
    o_ref[...] = (logits + b2_ref[...]).astype(o_ref.dtype)


def _round_up(a, m):
    return pl.cdiv(a, m) * m


def classification_head(x, w1, b1, w2, b2, *, tile_m=None):
    """x: (N, input_dim) f32 -> logits (N, num_classes) f32."""
    n, d = x.shape
    hidden = w1.shape[-1]
    num_classes = w2.shape[-1]

    x = x.astype(jnp.float32)
    w1 = w1.astype(jnp.float32)
    w2 = w2.astype(jnp.float32)
    b1 = b1.reshape(1, hidden).astype(jnp.float32)
    b2 = b2.reshape(1, num_classes).astype(jnp.float32)

    # --- VMEM-aware batch-tile selection -------------------------------------
    try:  # v5e/v6e: 128 MiB physical; v7x: 64 MiB per TensorCore.
        vmem_cap = int(pltpu.get_tpu_info().vmem_capacity_bytes)
    except Exception:
        vmem_cap = 64 << 20  # conservative fallback (v7x per-TC)
    scoped_vmem = min(vmem_cap // 2, 32 << 20)  # what we ask the compiler for
    weight_bytes = 2 * 4 * (d * hidden + hidden + hidden * num_classes + num_classes)
    tile_budget = max(1 << 20, scoped_vmem - weight_bytes - (2 << 20))
    # per-row VMEM: double-buffered x (f32) + double-buffered out + h/logits temps
    bytes_per_row = 4 * (2 * d + 2 * hidden + 4 * num_classes)

    if tile_m is None:
        # Large tiles amortize the ~0.35us per-grid-step overhead (mem-bound op).
        tile_m = 8192 if d <= 512 else 2048
    tile_m = max(16, _round_up(tile_m, 16))            # 16-row sublane packing
    tile_m = min(tile_m, max(16, (tile_budget // bytes_per_row) // 16 * 16))
    if n >= 32:
        # Keep >=2 grid steps so ("parallel",) can use both v7x TensorCores.
        tile_m = min(tile_m, _round_up(pl.cdiv(n, 2), 16))
    if tile_m >= n:
        tile_m = n  # single block == full array dim (always a legal block shape)

    grid = (pl.cdiv(n, tile_m),)

    return pl.pallas_call(
        _head_kernel,
        out_shape=jax.ShapeDtypeStruct((n, num_classes), jnp.float32),
        grid=grid,
        in_specs=[
            # x tile moves with the grid; weights/biases stay VMEM-resident.
            pl.BlockSpec((tile_m, d), lambda i: (i, 0)),
            pl.BlockSpec((d, hidden), lambda i: (0, 0)),
            pl.BlockSpec((1, hidden), lambda i: (0, 0)),
            pl.BlockSpec((hidden, num_classes), lambda i: (0, 0)),
            pl.BlockSpec((1, num_classes), lambda i: (0, 0)),
        ],
        out_specs=pl.BlockSpec((tile_m, num_classes), lambda i: (i, 0)),
        compiler_params=pltpu.CompilerParams(
            dimension_semantics=("parallel",),
            vmem_limit_bytes=scoped_vmem,
        ),
    )(x, w1, b1, w2, b2)


def init_params(key, input_dim, num_classes, hidden=64):
    """Deterministic synthetic params (PyTorch nn.Linear-style uniform init)."""
    k1, k2, k3, k4 = jax.random.split(key, 4)
    bound1 = 1.0 / (input_dim ** 0.5)
    bound2 = 1.0 / (hidden ** 0.5)
    w1 = jax.random.uniform(k1, (input_dim, hidden), jnp.float32, -bound1, bound1)
    b1 = jax.random.uniform(k2, (hidden,), jnp.float32, -bound1, bound1)
    w2 = jax.random.uniform(k3, (hidden, num_classes), jnp.float32, -bound2, bound2)
    b2 = jax.random.uniform(k4, (num_classes,), jnp.float32, -bound2, bound2)
    return w1, b1, w2, b2


def _ref(x, w1, b1, w2, b2):
    """Plain-JAX f32 reference of the module's forward pass."""
    h = jnp.maximum(jnp.dot(x, w1, preferred_element_type=jnp.float32) + b1, 0.0)
    return jnp.dot(h, w2, preferred_element_type=jnp.float32) + b2


if __name__ == "__main__":
    key = jax.random.PRNGKey(0)
    kx, kp, kx2 = jax.random.split(key, 3)

    batch = 2
    input_dim = 32
    num_classes = 12

    x = jax.random.normal(kx, (batch, input_dim), jnp.float32)
    w1, b1, w2, b2 = init_params(kp, input_dim, num_classes)

    # Small-batch sanity run (single full-array block).
    logits = classification_head(x, w1, b1, w2, b2)
    jax.block_until_ready(logits)
    assert logits.shape == (batch, num_classes)
    assert jnp.allclose(logits, _ref(x, w1, b1, w2, b2), atol=2e-2, rtol=2e-2)

    # Multi-tile run with a ragged last block (exercises boundary masking and the
    # >=2-tile megacore split path).
    batch2 = 300
    x2 = jax.random.normal(kx2, (batch2, input_dim), jnp.float32)
    logits2 = classification_head(x2, w1, b1, w2, b2, tile_m=128)
    jax.block_until_ready(logits2)
    assert logits2.shape == (batch2, num_classes)
    assert jnp.allclose(logits2, _ref(x2, w1, b1, w2, b2), atol=2e-2, rtol=2e-2)

    print("KERNEL_OK")
</pallas_src>

<mosaic_0001>
module attributes {stable_mosaic.version = 11 : i64} {
  func.func @_head_kernel(%arg0: i32, %arg1: memref<2x32xf32, #tpu.memory_space<vmem>>, %arg2: memref<32x64xf32, #tpu.memory_space<vmem>>, %arg3: memref<1x64xf32, #tpu.memory_space<vmem>>, %arg4: memref<64x12xf32, #tpu.memory_space<vmem>>, %arg5: memref<1x12xf32, #tpu.memory_space<vmem>>, %arg6: memref<2x12xf32, #tpu.memory_space<vmem>>) attributes {dimension_semantics = [#tpu.dimension_semantics<parallel>], iteration_bounds = array<i64: 1>, scalar_prefetch = 0 : i64, scratch_operands = 0 : i64, tpu.core_type = #tpu.core_type<tc>, window_params = [{transform_indices = @transform_0, window_bounds = array<i64: 2, 32>}, {pipeline_mode = #tpu.pipeline_mode<synchronous>, transform_indices = @transform_1, window_bounds = array<i64: 32, 64>}, {pipeline_mode = #tpu.pipeline_mode<synchronous>, transform_indices = @transform_2, window_bounds = array<i64: 1, 64>}, {pipeline_mode = #tpu.pipeline_mode<synchronous>, transform_indices = @transform_3, window_bounds = array<i64: 64, 12>}, {pipeline_mode = #tpu.pipeline_mode<synchronous>, transform_indices = @transform_4, window_bounds = array<i64: 1, 12>}, {transform_indices = @transform_5, window_bounds = array<i64: 2, 12>}]} {
    %c0 = arith.constant 0 : index
    %c0_0 = arith.constant 0 : index
    %0 = vector.load %arg1[%c0, %c0_0] : memref<2x32xf32, #tpu.memory_space<vmem>>, vector<2x32xf32>
    %c0_1 = arith.constant 0 : index
    %c0_2 = arith.constant 0 : index
    %1 = vector.load %arg2[%c0_1, %c0_2] : memref<32x64xf32, #tpu.memory_space<vmem>>, vector<32x64xf32>
    %cst = arith.constant dense<0.000000e+00> : vector<2x64xf32>
    %2 = tpu.matmul %0, %1, %cst {dimension_numbers = #tpu.dot_dimension_numbers<[1], [0], [0], [1], [0, 0, 1, 1], [], []>} : vector<2x32xf32>, vector<32x64xf32>, vector<2x64xf32> -> vector<2x64xf32>
    %c0_3 = arith.constant 0 : index
    %c0_4 = arith.constant 0 : index
    %3 = vector.load %arg3[%c0_3, %c0_4] : memref<1x64xf32, #tpu.memory_space<vmem>>, vector<1x64xf32>
    %4 = vector.broadcast %3 : vector<1x64xf32> to vector<2x64xf32>
    %5 = arith.addf %2, %4 : vector<2x64xf32>
    %cst_5 = arith.constant 0.000000e+00 : f32
    %6 = vector.broadcast %cst_5 : f32 to vector<2x64xf32>
    %7 = arith.maximumf %5, %6 : vector<2x64xf32>
    %c0_6 = arith.constant 0 : index
    %c0_7 = arith.constant 0 : index
    %8 = vector.load %arg4[%c0_6, %c0_7] : memref<64x12xf32, #tpu.memory_space<vmem>>, vector<64x12xf32>
    %cst_8 = arith.constant dense<0.000000e+00> : vector<2x12xf32>
    %9 = tpu.matmul %7, %8, %cst_8 {dimension_numbers = #tpu.dot_dimension_numbers<[1], [0], [0], [1], [0, 0, 1, 1], [], []>} : vector<2x64xf32>, vector<64x12xf32>, vector<2x12xf32> -> vector<2x12xf32>
    %c0_9 = arith.constant 0 : index
    %c0_10 = arith.constant 0 : index
    %10 = vector.load %arg5[%c0_9, %c0_10] : memref<1x12xf32, #tpu.memory_space<vmem>>, vector<1x12xf32>
    %11 = vector.broadcast %10 : vector<1x12xf32> to vector<2x12xf32>
    %12 = arith.addf %9, %11 : vector<2x12xf32>
    %c0_11 = arith.constant 0 : index
    %c0_12 = arith.constant 0 : index
    %13 = vector.load %arg6[%c0_11, %c0_12] : memref<2x12xf32, #tpu.memory_space<vmem>>, vector<2x12xf32>
    tpu.vector_store %arg6[%c0_11, %c0_12], %12 {strides = array<i32>} : memref<2x12xf32, #tpu.memory_space<vmem>>, vector<2x12xf32>,
    return
  }
  func.func @transform_0(%arg0: i32) -> (i32, i32) {
    %c0_i32 = arith.constant 0 : i32
    %c0_i32_0 = arith.constant 0 : i32
    return %arg0, %c0_i32 : i32, i32
  }
  func.func @transform_1(%arg0: i32) -> (i32, i32) {
    %c0_i32 = arith.constant 0 : i32
    %c0_i32_0 = arith.constant 0 : i32
    %c0_i32_1 = arith.constant 0 : i32
    return %c0_i32, %c0_i32_0 : i32, i32
  }
  func.func @transform_2(%arg0: i32) -> (i32, i32) {
    %c0_i32 = arith.constant 0 : i32
    %c0_i32_0 = arith.constant 0 : i32
    %c0_i32_1 = arith.constant 0 : i32
    return %c0_i32, %c0_i32_0 : i32, i32
  }
  func.func @transform_3(%arg0: i32) -> (i32, i32) {
    %c0_i32 = arith.constant 0 : i32
    %c0_i32_0 = arith.constant 0 : i32
    %c0_i32_1 = arith.constant 0 : i32
    return %c0_i32, %c0_i32_0 : i32, i32
  }
  func.func @transform_4(%arg0: i32) -> (i32, i32) {
    %c0_i32 = arith.constant 0 : i32
    %c0_i32_0 = arith.constant 0 : i32
    %c0_i32_1 = arith.constant 0 : i32
    return %c0_i32, %c0_i32_0 : i32, i32
  }
  func.func @transform_5(%arg0: i32) -> (i32, i32) {
    %c0_i32 = arith.constant 0 : i32
    %c0_i32_0 = arith.constant 0 : i32
    return %arg0, %c0_i32 : i32, i32
  }
}

</mosaic_0001>

<bundles_post_ra>
// kernel: tpu_custom_call.1
= control target key start
LH: loop header
LB: loop body
LE: loop exit
PB: predicated region body
PF: predicated region fallthrough
CT: control target
= control target key end

     0   :  { %s219_s0 = inlined_call_operand.vmem [shape: f32[2,32], index: 0, kind: input, shape index: {}]   ;;  %s220_s1 = inlined_call_operand.vmem [shape: f32[32,64], index: 1, kind: input, shape index: {}]   ;;  %s221_s2 = inlined_call_operand.vmem [shape: f32[1,64], index: 2, kind: input, shape index: {}]   ;;  %s222_s3 = inlined_call_operand.vmem [shape: f32[64,12], index: 3, kind: input, shape index: {}]   ;;  %s223_s4 = inlined_call_operand.vmem [shape: f32[1,12], index: 4, kind: input, shape index: {}]   ;;  %s224_s5 = inlined_call_operand.hbm [shape: f32[2,12], index: 5, kind: output, shape index: {}]  }
   0x1   :  { %v25_v0 = vld [vmem:[%s220_s1 + $0x18] sm:$0xff]  ;;  %v24_v1 = vld [vmem:[%s220_s1 + $0x10] sm:$0xff]  ;;  %v23_v3 = vld [vmem:[%s220_s1 + $0x8] sm:$0xff] }
   0x2   :  { %46 = vmatpush.msra.mxu0 %v25_v0  ;;  %v62_v2 = vld [vmem:[%s222_s3 + $0x38] sm:$0xff]  ;;  %v61_v4 = vld [vmem:[%s222_s3 + $0x30] sm:$0xff]  ;;  %v60_v5 = vld [vmem:[%s222_s3 + $0x28] sm:$0xff] }
   0x3   :  { %79 = vmatpush.msra.mxu1 %v62_v2  ;;  %v22_v6 = vld [vmem:[%s220_s1] sm:$0xff] }
   0x4   :  { %47 = vmatpush.msra.mxu0 %v24_v1 }
   0x5   :  { %80 = vmatpush.msra.mxu1 %v61_v4 }
   0x6   :  { %10 = vsyncpa [#allocation3], 0  ;;  %48 = vmatpush.msra.mxu0 %v23_v3  ;;  %v21_v7 = vld [vmem:[%s219_s0] sm:$0x3]  ;;  %vm30_vm0 = vcmask 261120   ;;  %v58_v9 = vld [vmem:[%s222_s3 + $0x18] sm:$0xff] }
   0x7   :  { %v59_v8 = vld [vmem:[%s222_s3 + $0x20] sm:$0xff]  ;;  %81 = vmatpush.msra.mxu1 %v60_v5  ;;  %v57_v10 = vld [vmem:[%s222_s3 + $0x10] sm:$0xff]  ;;  %v56_v11 = vld [vmem:[%s222_s3 + $0x8] sm:$0xff]  ;;  %vm67_vm1 = vcmask 523264   ;;  %s140_s21 = smov [#allocation2]   ;;  %vm91_vm2 = vcmask 91136  }
   0x8   :  { %49 = vmatpush.msra.mxu0 %v22_v6  ;;  %v55_v12 = vld [vmem:[%s222_s3] sm:$0xff]  ;;  %s98_s22 = sshll.u32 %s140_s21, 4  ;;  %s100_s3 = sshll.u32 %s224_s5, 4  ;;  %s99_s22 = int_to_ptr.vmem [resolvable:$true] %s98_s22  ;;  %s101_s3 = int_to_ptr.hbm [resolvable:$true] %s100_s3 }
   0x9   :  { %109 = vmatmul.msk.f32.vlgmr.msra.gmra.mxu0 %vm30_vm0, %v21_v7  ;;  %82 = vmatpush.msra.mxu1 %v59_v8  ;;  %v112_v13 = vld [vmem:[%s221_s2] ss:$0 sm:$0xff] }
   0xa   :  { %v113_v17 = vld [vmem:[%s223_s4] ss:$0 sm:$0xff] }
   0xb   :  { %83 = vmatpush.msra.mxu1 %v58_v9 }
   0xd   :  { %84 = vmatpush.msra.mxu1 %v57_v10 }
   0xf   :  { %85 = vmatpush.msra.mxu1 %v56_v11 }
  0x11   :  { %86 = vmatpush.msra.mxu1 %v55_v12 }
  0x86   :  { %v51_v14 = vpop.f32.mrf.mxu0 }
  0x87   :  { %v52_v15 = vadd.f32 %v112_v13, %v51_v14 }
  0x89   :  { %v54_v16 = vmax.f32 %v52_v15, 0.0 }
  0x8b   :  { %110 = vmatmul.msk.f32.vlgmr.msra.gmra.mxu1 %vm67_vm1, %v54_v16 }
 0x108   :  { %v88_v18 = vpop.f32.mrf.mxu1 }
 0x109   :  { %v89_v19 = vadd.f32 %v113_v17, %v88_v18 }
 0x10b   :  { %92 = vst.msk [vmem:[#allocation2] sm:$0x3] %vm91_vm2, %v89_v19 }
 0x10c   :  { %103 = dma.vmem_to_hbm [thread:$0]  %s99_s22, 32, %s101_s3, [#allocation3]  }
 0x10d   :  { %138 = dma.done.wait [#allocation3], 32  }
 0x10e   :  { %139 = vsyncadd [#allocation3], 4294967264 }
 0x10f   :  { %108 = vsyncpa [#allocation3], 1 }

</bundles_post_ra>
